<compile_context>
chip_gen: v7x
topology: tpu7x:2x2x1
jax: 0.10.0
libtpu: 0.0.40
codegen_flags: <defaults>
</compile_context>

<pallas_src>
import math

import jax
import jax.numpy as jnp
from jax.experimental import pallas as pl
from jax.experimental.pallas import tpu as pltpu

LANES = 128      # vreg lane width
SUBLANES = 8     # f32 vreg sublane count


def _gaussian_logprob_kernel(params_ref, x_ref, o_ref):
    """Elementwise Gaussian log-density on a lane-dense (block_rows, 128) tile.

    params_ref: SMEM f32[3] = [mean, -1/(2*std^2), -log(std) - 0.5*log(2*pi)]
    x_ref:      VMEM (block_rows, 128), input dtype (f32 / bf16 / f16)
    o_ref:      VMEM f32 (block_rows, 128)
    """
    mean = params_ref[0]
    neg_inv_2var = params_ref[1]
    const = params_ref[2]
    diff = x_ref[...].astype(jnp.float32) - mean
    o_ref[...] = diff * diff * neg_inv_2var + const


def gaussian_node_forward(
    x: jax.Array,
    mean: jax.Array,
    std: jax.Array,
    scope: int,
    *,
    block_rows: int = 4096,
) -> jax.Array:
    """Pallas equivalent of GaussianNode.forward: Normal(mean, std).log_prob(x[:, scope]).

    Args:
      x: (B, F) floating input.
      mean: scalar or (1,) parameter.
      std: scalar or (1,) parameter (> 0; unguarded, like the PyTorch forward).
      scope: static column index into the feature axis.
      block_rows: rows of the lane-dense (rows, 128) layout per grid step
        (rounded to a multiple of 8; 4096 -> 2 MiB f32 blocks, safe on v5e's
        16 MiB scoped-VMEM default; use 8192-16384 on v6e/v7x).

    Returns:
      (B,) float32 log-probabilities.
    """
    B = x.shape[0]

    # --- layout plumbing (fuses into one producer pass under jit) ---
    col = x[:, scope]
    if not (jnp.issubdtype(col.dtype, jnp.floating) and col.dtype.itemsize <= 4):
        col = col.astype(jnp.float32)            # ints / f64 -> f32; bf16/f16 pass through

    rows = -(-B // LANES)                        # ceil(B / 128)
    rows = -(-rows // SUBLANES) * SUBLANES       # round up to sublane multiple (<= 1023 elems pad)
    block_rows = max(SUBLANES, min(block_rows, rows))
    block_rows = (block_rows // SUBLANES) * SUBLANES   # multiple of 8: respects (8,128) rule
    num_blocks = -(-rows // block_rows)                # last block may be partial (masked edge)

    col2d = jnp.pad(col, (0, rows * LANES - B)).reshape(rows, LANES)   # lane-dense slab

    # --- hoisted scalar math (once, not per element) ---
    mean_s = jnp.asarray(mean, jnp.float32).reshape(-1)[0]
    std_s = jnp.asarray(std, jnp.float32).reshape(-1)[0]
    neg_inv_2var = -0.5 / (std_s * std_s)
    const = -jnp.log(std_s) - jnp.float32(0.5 * math.log(2.0 * math.pi))
    params = jnp.stack([mean_s, neg_inv_2var, const])   # f32[3] -> SMEM

    out2d = pl.pallas_call(
        _gaussian_logprob_kernel,
        out_shape=jax.ShapeDtypeStruct((rows, LANES), jnp.float32),
        grid_spec=pltpu.PrefetchScalarGridSpec(
            num_scalar_prefetch=0,
            grid=(num_blocks,),
            in_specs=[
                pl.BlockSpec(memory_space=pltpu.SMEM),                # params f32[3]
                pl.BlockSpec((block_rows, LANES), lambda i: (i, 0)),  # lane-dense input tile
            ],
            out_specs=pl.BlockSpec((block_rows, LANES), lambda i: (i, 0)),
        ),
        compiler_params=pltpu.CompilerParams(
            # Batch-row blocks are independent -> megacore-shardable on v7x.
            dimension_semantics=("parallel",),
        ),
    )(params, col2d)

    # Free reshape; the [:B] slice fuses with downstream consumers under jit.
    return out2d.reshape(-1)[:B]


def _reference(x, mean, std, scope):
    col = x[:, scope].astype(jnp.float32)
    m = jnp.asarray(mean, jnp.float32).reshape(-1)[0]
    s = jnp.asarray(std, jnp.float32).reshape(-1)[0]
    return -((col - m) ** 2) / (2.0 * s * s) - jnp.log(s) - 0.5 * jnp.log(2.0 * jnp.pi)


if __name__ == "__main__":
    key = jax.random.PRNGKey(0)
    kx, km, ks, kx2, kx3 = jax.random.split(key, 5)

    fwd = jax.jit(gaussian_node_forward, static_argnames=("scope", "block_rows"))

    # --- small case matching the module's forward (B=2, F=4) ---
    B, F = 2, 4
    scope = 1
    x = jax.random.normal(kx, (B, F), dtype=jnp.float32)
    mean = jax.random.normal(km, (1,), dtype=jnp.float32)
    std = jax.random.uniform(ks, (1,), dtype=jnp.float32, minval=0.1, maxval=1.0)

    out = fwd(x, mean, std, scope=scope)
    jax.block_until_ready(out)
    assert out.shape == (B,)
    assert jnp.allclose(out, _reference(x, mean, std, scope), atol=1e-5, rtol=1e-5)

    # --- multi-block grid with even division (f32) ---
    B2 = 2000
    x2 = jax.random.normal(kx2, (B2, F), dtype=jnp.float32)
    out2 = fwd(x2, mean, std, scope=scope, block_rows=8)   # rows=16 -> grid of 2 blocks
    jax.block_until_ready(out2)
    assert out2.shape == (B2,)
    assert jnp.allclose(out2, _reference(x2, mean, std, scope), atol=1e-5, rtol=1e-5)

    # --- partial (masked) edge block + bf16 passthrough with in-kernel cast ---
    B3 = 2600
    x3 = jax.random.normal(kx3, (B3, F), dtype=jnp.bfloat16)
    out3 = fwd(x3, mean, std, scope=scope, block_rows=16)  # rows=24 -> 2 blocks, 2nd partial
    jax.block_until_ready(out3)
    assert out3.shape == (B3,)
    assert out3.dtype == jnp.float32
    assert jnp.allclose(out3, _reference(x3, mean, std, scope), atol=1e-4, rtol=1e-5)

    print("KERNEL_OK")
</pallas_src>

<mosaic_0001>
module attributes {stable_mosaic.version = 11 : i64} {
  func.func @_gaussian_logprob_kernel(%arg0: i32, %arg1: memref<3xf32, #tpu.memory_space<smem>>, %arg2: memref<8x128xf32, #tpu.memory_space<vmem>>, %arg3: memref<8x128xf32, #tpu.memory_space<vmem>>) attributes {dimension_semantics = [#tpu.dimension_semantics<parallel>], iteration_bounds = array<i64: 1>, scalar_prefetch = 0 : i64, scratch_operands = 0 : i64, tpu.core_type = #tpu.core_type<tc>, window_params = [{transform_indices = @transform_0, window_bounds = array<i64: 3>}, {transform_indices = @transform_1, window_bounds = array<i64: 8, 128>}, {transform_indices = @transform_2, window_bounds = array<i64: 8, 128>}]} {
    %c0 = arith.constant 0 : index
    %0 = memref.load %arg1[%c0] : memref<3xf32, #tpu.memory_space<smem>>
    %c1 = arith.constant 1 : index
    %1 = memref.load %arg1[%c1] : memref<3xf32, #tpu.memory_space<smem>>
    %c2 = arith.constant 2 : index
    %2 = memref.load %arg1[%c2] : memref<3xf32, #tpu.memory_space<smem>>
    %c0_0 = arith.constant 0 : index
    %c0_1 = arith.constant 0 : index
    %3 = vector.load %arg2[%c0_0, %c0_1] : memref<8x128xf32, #tpu.memory_space<vmem>>, vector<8x128xf32>
    %4 = vector.broadcast %0 : f32 to vector<8x128xf32>
    %5 = arith.subf %3, %4 : vector<8x128xf32>
    %6 = arith.mulf %5, %5 : vector<8x128xf32>
    %7 = vector.broadcast %1 : f32 to vector<8x128xf32>
    %8 = arith.mulf %6, %7 : vector<8x128xf32>
    %9 = vector.broadcast %2 : f32 to vector<8x128xf32>
    %10 = arith.addf %8, %9 : vector<8x128xf32>
    %c0_2 = arith.constant 0 : index
    %c0_3 = arith.constant 0 : index
    %11 = vector.load %arg3[%c0_2, %c0_3] : memref<8x128xf32, #tpu.memory_space<vmem>>, vector<8x128xf32>
    tpu.vector_store %arg3[%c0_2, %c0_3], %10 {strides = array<i32>} : memref<8x128xf32, #tpu.memory_space<vmem>>, vector<8x128xf32>,
    return
  }
  func.func @transform_0(%arg0: i32) -> i32 {
    %c0_i32 = arith.constant 0 : i32
    %c0_i32_0 = arith.constant 0 : i32
    return %c0_i32 : i32
  }
  func.func @transform_1(%arg0: i32) -> (i32, i32) {
    %c0_i32 = arith.constant 0 : i32
    %c0_i32_0 = arith.constant 0 : i32
    return %arg0, %c0_i32 : i32, i32
  }
  func.func @transform_2(%arg0: i32) -> (i32, i32) {
    %c0_i32 = arith.constant 0 : i32
    %c0_i32_0 = arith.constant 0 : i32
    return %arg0, %c0_i32 : i32, i32
  }
}

</mosaic_0001>

<bundles_post_ra>
// kernel: gaussian_node_forward.1
= control target key start
LH: loop header
LB: loop body
LE: loop exit
PB: predicated region body
PF: predicated region fallthrough
CT: control target
= control target key end

     0   :  { %7 = vsyncpa [#allocation3], 0  ;;  %s83_s0 = inlined_call_operand.vmem [shape: f32[3], index: 0, kind: input, shape index: {}]   ;;  %s84_s1 = inlined_call_operand.vmem [shape: f32[8,128], index: 1, kind: input, shape index: {}]   ;;  %s85_s2 = inlined_call_operand.vmem [shape: f32[8,128], index: 2, kind: output, shape index: {}]  }
   0x1   :  { %s14_s11 = sshll.u32 %s83_s0, 4  ;;  %s15_s11 = int_to_ptr.vmem [resolvable:$true] %s14_s11 }
   0x2   :  { %s44_s12 = scalar_lea.vmem %s15_s11, 16  ;;  %p49_p1 = scmp.lt.s32.totalorder %s15_s11, %s15_s11 }
   0x3   :  { %p45_p0 = scmp.ne.s32.totalorder %s15_s11, %s44_s12  ;;  %p50_p2 = scmp.lt.s32.totalorder %s44_s12, %s44_s12 }
   0x5   :  { %p51_p3 = por %p50_p2, %p49_p1 }
   0x7   :  { %p52_p4 = pnand %p51_p3, %p45_p0 }
   0x9   :  { %55 = shalt.err (!%p52_p4)
}
   0xa   :  { %s58_s13 = smov [#allocation2]  }
   0xb   :  { %17 = dma.vmem_to_smem %s15_s11, 16, %s58_s13, [#allocation3]  }
   0xc   :  { %56 = dma.done.wait [#allocation3], 16  }
   0xd   :  { %57 = vsyncadd [#allocation3], 4294967280 }
   0xe   :  { %23 = sfence }
   0xf   :  { %s24_s14 = sld [smem:[#allocation2]]  ;;  %s41_s15 = sld [smem:[#allocation2 + $0x1]]  ;;  %v27_v0 = vld [vmem:[%s84_s1] sm:$0xff] }
  0x10   :  { %s42_s16 = sld [smem:[#allocation2 + $0x2]] }
  0x15   :  { %v28_v1 = vstv %s24_s14  ;;  %v31_v3 = vstv %s41_s15 }
  0x16   :  { %v29_v2 = vsub.f32 %v27_v0, %v28_v1  ;;  %v33_v5 = vstv %s42_s16 }
  0x18   :  { %v30_v4 = vmul.f32 %v29_v2, %v29_v2 }
  0x1a   :  { %v32_v6 = vmul.f32 %v31_v3, %v30_v4 }
  0x1c   :  { %v34_v7 = vadd.f32 %v33_v5, %v32_v6 }
  0x1e   :  { %35 = vst [vmem:[%s85_s2] sm:$0xff] %v34_v7 }
  0x1f   :  { %40 = vsyncpa [#allocation3], 1 }

</bundles_post_ra>
